<compile_context>
chip_gen: v7x
topology: tpu7x:2x2x1
jax: 0.10.0
libtpu: 0.0.40
codegen_flags: <defaults>
</compile_context>

<pallas_src>
import functools

import jax
import jax.numpy as jnp
from jax.experimental import pallas as pl
from jax.experimental.pallas import tpu as pltpu


def _gate_kernel(x1_ref, x2_ref, wa_ref, wb_ref, b_ref, o_ref):
    # x1/x2: (TMP, P*K) bf16 streamed tiles; wa/wb: (P*K, 2*P*N) bf16 resident
    # ([gate | fusion] block-diagonal weights); b: (1, P*N) f32 resident.
    pre = jnp.dot(x1_ref[...], wa_ref[...], preferred_element_type=jnp.float32)
    pre = pre + jnp.dot(x2_ref[...], wb_ref[...],
                        preferred_element_type=jnp.float32)
    pn = b_ref.shape[-1]                       # = P*N (lane-aligned split point)
    s = jax.nn.sigmoid(pre[:, :pn] + b_ref[...])   # EUP
    fusion = jnp.tanh(pre[:, pn:])                 # EUP
    o_ref[...] = (s * fusion).astype(o_ref.dtype)


def _round_up(v, m):
    return ((v + m - 1) // m) * m


def _cdiv(a, b):
    return (a + b - 1) // b


def _block_diag(w, p):
    """(K, N) -> (p*K, p*N) block-diagonal with p copies of w on the diagonal."""
    return jnp.kron(jnp.eye(p, dtype=w.dtype), w)


@functools.partial(jax.jit, static_argnames=("tile_m",))
def gate_forward(x1, x2, w1, w2, w3, w4, b1, b2, *, tile_m=8192):
    """x1, x2: (M, K); w*: (K, N) (already transposed from PyTorch's (N, K));
    b*: (N,) or (1, N).  Returns (M, N) float32.

    Activations are cast to bfloat16 at the kernel boundary; pass bf16 inputs
    directly to skip the f32->bf16 conversion pass.
    """
    M, K = x1.shape
    N = w1.shape[1]
    assert x2.shape == (M, K)
    assert w2.shape == (K, N) and w3.shape == (K, N) and w4.shape == (K, N)
    # Lane-dense packing: P logical rows per 128-lane vreg row.
    # TODO(synk): add an unpacked fallback for dims that don't divide 128.
    assert 128 % K == 0 and 128 % N == 0, "packed path needs K and N to divide 128"
    P = min(128 // K, 128 // N)
    PK, PN = P * K, P * N

    # --- wrapper-side weight/bias prep (tiny, done once) ----------------------
    wa = jnp.concatenate(
        [_block_diag(jnp.asarray(w1, jnp.float32), P),
         _block_diag(jnp.asarray(w3, jnp.float32), P)], axis=1
    ).astype(jnp.bfloat16)                                     # (PK, 2*PN)
    wb = jnp.concatenate(
        [_block_diag(jnp.asarray(w2, jnp.float32), P),
         _block_diag(jnp.asarray(w4, jnp.float32), P)], axis=1
    ).astype(jnp.bfloat16)                                     # (PK, 2*PN)
    b = (jnp.asarray(b1, jnp.float32).reshape(1, N)
         + jnp.asarray(b2, jnp.float32).reshape(1, N))
    b = jnp.tile(b, (1, P))                                    # (1, PN) f32

    # --- tile choice (in logical rows) ----------------------------------------
    G = 16 * P                     # packed tile rows stay a multiple of 16
    tm = _round_up(min(tile_m, _round_up(M, G)), G)
    if M > 4 * G:                  # keep >= ~4 grid steps so v7x's 2 TCs split M
        tm = min(tm, _round_up(_cdiv(M, 4), G))
    M_pad = _round_up(M, tm)
    grid_m = M_pad // tm
    tmp = tm // P                  # packed-row tile height
    mp_pad = M_pad // P

    # --- activation packing + bf16 cast (fuses under jit) ----------------------
    def pack(x):
        x = jnp.asarray(x)
        if M_pad != M:
            x = jnp.pad(x, ((0, M_pad - M), (0, 0)))
        return x.reshape(mp_pad, PK).astype(jnp.bfloat16)      # free row-major view

    x1p, x2p = pack(x1), pack(x2)

    # VMEM: double-buffered x/out tiles + resident weights/bias (+ headroom),
    # clamped to 16 MiB (safe on every generation's scoped-VMEM default).
    need = (2 * (2 * tmp * PK * 2 + tmp * PN * 4)     # 2x bf16 in, f32 out, x2 bufs
            + 2 * PK * (2 * PN) * 2 + PN * 4)         # resident weights + bias
    vmem_limit = int(min(max(2 * need, 4 << 20), 16 << 20))

    out = pl.pallas_call(
        _gate_kernel,
        out_shape=jax.ShapeDtypeStruct((mp_pad, PN), jnp.float32),
        grid_spec=pltpu.PrefetchScalarGridSpec(
            num_scalar_prefetch=0,
            grid=(grid_m,),
            in_specs=[
                pl.BlockSpec((tmp, PK), lambda i: (i, 0)),       # x1 (streamed)
                pl.BlockSpec((tmp, PK), lambda i: (i, 0)),       # x2 (streamed)
                pl.BlockSpec((PK, 2 * PN), lambda i: (0, 0)),    # [W1|W3] resident
                pl.BlockSpec((PK, 2 * PN), lambda i: (0, 0)),    # [W2|W4] resident
                pl.BlockSpec((1, PN), lambda i: (0, 0)),         # fused bias resident
            ],
            out_specs=pl.BlockSpec((tmp, PN), lambda i: (i, 0)),
        ),
        compiler_params=pltpu.CompilerParams(
            dimension_semantics=("parallel",),   # shard M across TCs on v7x
            vmem_limit_bytes=vmem_limit,
        ),
    )(x1p, x2p, wa, wb, b)

    out = out.reshape(M_pad, N)    # free row-major un-packing
    # TODO(synk): when M isn't tile-aligned this slice is one extra HBM pass;
    # callers that can keep a padded output buffer should skip it.
    return out[:M] if M_pad != M else out


def _reference(x1, x2, w1, w2, w3, w4, b1, b2):
    s = jax.nn.sigmoid(x1 @ w1 + b1 + x2 @ w2 + b2)
    fusion = jnp.tanh(x1 @ w3 + x2 @ w4)
    return s * fusion


def _reference_bf16(x1, x2, w1, w2, w3, w4, b1, b2):
    # Same bf16 quantization of activations/weights as the kernel, f32 math.
    q = lambda a: jnp.asarray(a).astype(jnp.bfloat16).astype(jnp.float32)
    return _reference(q(x1), q(x2), q(w1), q(w2), q(w3), q(w4),
                      jnp.asarray(b1, jnp.float32), jnp.asarray(b2, jnp.float32))


def _xavier_normal(key, fan_in, fan_out, gain=1.0):
    std = gain * (2.0 / (fan_in + fan_out)) ** 0.5
    # PyTorch weight is (out, in); store transposed (in, out) for the kernel.
    return std * jax.random.normal(key, (fan_in, fan_out), dtype=jnp.float32)


if __name__ == "__main__":
    input_dim, output_dim = 32, 32
    batch = 8

    key = jax.random.PRNGKey(0)
    kx1, kx2, k1, k2, k3, k4, kb1, kb2 = jax.random.split(key, 8)

    x1 = jax.random.normal(kx1, (batch, input_dim), dtype=jnp.float32)
    x2 = jax.random.normal(kx2, (batch, input_dim), dtype=jnp.float32)

    w1 = _xavier_normal(k1, input_dim, output_dim)
    w2 = _xavier_normal(k2, input_dim, output_dim)
    w3 = _xavier_normal(k3, input_dim, output_dim)
    w4 = _xavier_normal(k4, input_dim, output_dim)

    # nn.Linear default bias init: U(-1/sqrt(fan_in), 1/sqrt(fan_in))
    bound = 1.0 / (input_dim ** 0.5)
    b1 = jax.random.uniform(kb1, (1, output_dim), jnp.float32, -bound, bound)
    b2 = jax.random.uniform(kb2, (1, output_dim), jnp.float32, -bound, bound)

    # Demo-sized run (single tile, padded to one 64-row block).
    out = jax.block_until_ready(gate_forward(x1, x2, w1, w2, w3, w4, b1, b2))
    assert out.shape == (batch, output_dim)
    ref_q = _reference_bf16(x1, x2, w1, w2, w3, w4, b1, b2)
    ref_f = _reference(x1, x2, w1, w2, w3, w4, b1, b2)
    assert jnp.allclose(out, ref_q, atol=5e-3, rtol=5e-3)   # kernel math check
    assert jnp.allclose(out, ref_f, atol=5e-2, rtol=0.0)    # bf16 I/O quantization

    # Ragged-M run exercising the tiled / padded multi-step grid path.
    M2 = 300
    kx3, kx4 = jax.random.split(jax.random.PRNGKey(1), 2)
    x1b = jax.random.normal(kx3, (M2, input_dim), dtype=jnp.float32)
    x2b = jax.random.normal(kx4, (M2, input_dim), dtype=jnp.float32)
    out_b = jax.block_until_ready(
        gate_forward(x1b, x2b, w1, w2, w3, w4, b1, b2, tile_m=128))
    assert out_b.shape == (M2, output_dim)
    ref_qb = _reference_bf16(x1b, x2b, w1, w2, w3, w4, b1, b2)
    ref_fb = _reference(x1b, x2b, w1, w2, w3, w4, b1, b2)
    assert jnp.allclose(out_b, ref_qb, atol=5e-3, rtol=5e-3)
    assert jnp.allclose(out_b, ref_fb, atol=5e-2, rtol=0.0)

    print("KERNEL_OK")
</pallas_src>

<mosaic_0001>
module attributes {stable_mosaic.version = 11 : i64} {
  func.func @_gate_kernel(%arg0: i32, %arg1: memref<16x128xbf16, #tpu.memory_space<vmem>>, %arg2: memref<16x128xbf16, #tpu.memory_space<vmem>>, %arg3: memref<128x256xbf16, #tpu.memory_space<vmem>>, %arg4: memref<128x256xbf16, #tpu.memory_space<vmem>>, %arg5: memref<1x128xf32, #tpu.memory_space<vmem>>, %arg6: memref<16x128xf32, #tpu.memory_space<vmem>>) attributes {dimension_semantics = [#tpu.dimension_semantics<parallel>], iteration_bounds = array<i64: 1>, scalar_prefetch = 0 : i64, scratch_operands = 0 : i64, tpu.core_type = #tpu.core_type<tc>, window_params = [{transform_indices = @transform_0, window_bounds = array<i64: 16, 128>}, {transform_indices = @transform_1, window_bounds = array<i64: 16, 128>}, {pipeline_mode = #tpu.pipeline_mode<synchronous>, transform_indices = @transform_2, window_bounds = array<i64: 128, 256>}, {pipeline_mode = #tpu.pipeline_mode<synchronous>, transform_indices = @transform_3, window_bounds = array<i64: 128, 256>}, {pipeline_mode = #tpu.pipeline_mode<synchronous>, transform_indices = @transform_4, window_bounds = array<i64: 1, 128>}, {transform_indices = @transform_5, window_bounds = array<i64: 16, 128>}]} {
    %c0 = arith.constant 0 : index
    %c0_0 = arith.constant 0 : index
    %0 = vector.load %arg1[%c0, %c0_0] : memref<16x128xbf16, #tpu.memory_space<vmem>>, vector<16x128xbf16>
    %c0_1 = arith.constant 0 : index
    %c0_2 = arith.constant 0 : index
    %1 = vector.load %arg3[%c0_1, %c0_2] : memref<128x256xbf16, #tpu.memory_space<vmem>>, vector<128x256xbf16>
    %cst = arith.constant dense<0.000000e+00> : vector<16x256xf32>
    %2 = tpu.matmul %0, %1, %cst {dimension_numbers = #tpu.dot_dimension_numbers<[1], [0], [0], [1], [0, 0, 1, 1], [], []>} : vector<16x128xbf16>, vector<128x256xbf16>, vector<16x256xf32> -> vector<16x256xf32>
    %c0_3 = arith.constant 0 : index
    %c0_4 = arith.constant 0 : index
    %3 = vector.load %arg2[%c0_3, %c0_4] : memref<16x128xbf16, #tpu.memory_space<vmem>>, vector<16x128xbf16>
    %c0_5 = arith.constant 0 : index
    %c0_6 = arith.constant 0 : index
    %4 = vector.load %arg4[%c0_5, %c0_6] : memref<128x256xbf16, #tpu.memory_space<vmem>>, vector<128x256xbf16>
    %cst_7 = arith.constant dense<0.000000e+00> : vector<16x256xf32>
    %5 = tpu.matmul %3, %4, %cst_7 {dimension_numbers = #tpu.dot_dimension_numbers<[1], [0], [0], [1], [0, 0, 1, 1], [], []>} : vector<16x128xbf16>, vector<128x256xbf16>, vector<16x256xf32> -> vector<16x256xf32>
    %6 = arith.addf %2, %5 : vector<16x256xf32>
    %7 = vector.extract_strided_slice %6 {offsets = [0, 0], sizes = [16, 128], strides = [1, 1]} : vector<16x256xf32> to vector<16x128xf32>
    %c0_8 = arith.constant 0 : index
    %c0_9 = arith.constant 0 : index
    %8 = vector.load %arg5[%c0_8, %c0_9] : memref<1x128xf32, #tpu.memory_space<vmem>>, vector<1x128xf32>
    %9 = vector.broadcast %8 : vector<1x128xf32> to vector<16x128xf32>
    %10 = arith.addf %7, %9 : vector<16x128xf32>
    %11 = arith.negf %10 : vector<16x128xf32>
    %12 = math.exp %11 : vector<16x128xf32>
    %cst_10 = arith.constant 1.000000e+00 : f32
    %13 = vector.broadcast %cst_10 : f32 to vector<16x128xf32>
    %14 = arith.addf %13, %12 : vector<16x128xf32>
    %15 = arith.divf %13, %14 : vector<16x128xf32>
    %16 = vector.extract_strided_slice %6 {offsets = [0, 128], sizes = [16, 128], strides = [1, 1]} : vector<16x256xf32> to vector<16x128xf32>
    %17 = math.tanh %16 : vector<16x128xf32>
    %18 = arith.mulf %15, %17 : vector<16x128xf32>
    %c0_11 = arith.constant 0 : index
    %c0_12 = arith.constant 0 : index
    %19 = vector.load %arg6[%c0_11, %c0_12] : memref<16x128xf32, #tpu.memory_space<vmem>>, vector<16x128xf32>
    tpu.vector_store %arg6[%c0_11, %c0_12], %18 {strides = array<i32>} : memref<16x128xf32, #tpu.memory_space<vmem>>, vector<16x128xf32>,
    return
  }
  func.func @transform_0(%arg0: i32) -> (i32, i32) {
    %c0_i32 = arith.constant 0 : i32
    %c0_i32_0 = arith.constant 0 : i32
    return %arg0, %c0_i32 : i32, i32
  }
  func.func @transform_1(%arg0: i32) -> (i32, i32) {
    %c0_i32 = arith.constant 0 : i32
    %c0_i32_0 = arith.constant 0 : i32
    return %arg0, %c0_i32 : i32, i32
  }
  func.func @transform_2(%arg0: i32) -> (i32, i32) {
    %c0_i32 = arith.constant 0 : i32
    %c0_i32_0 = arith.constant 0 : i32
    %c0_i32_1 = arith.constant 0 : i32
    return %c0_i32, %c0_i32_0 : i32, i32
  }
  func.func @transform_3(%arg0: i32) -> (i32, i32) {
    %c0_i32 = arith.constant 0 : i32
    %c0_i32_0 = arith.constant 0 : i32
    %c0_i32_1 = arith.constant 0 : i32
    return %c0_i32, %c0_i32_0 : i32, i32
  }
  func.func @transform_4(%arg0: i32) -> (i32, i32) {
    %c0_i32 = arith.constant 0 : i32
    %c0_i32_0 = arith.constant 0 : i32
    %c0_i32_1 = arith.constant 0 : i32
    return %c0_i32, %c0_i32_0 : i32, i32
  }
  func.func @transform_5(%arg0: i32) -> (i32, i32) {
    %c0_i32 = arith.constant 0 : i32
    %c0_i32_0 = arith.constant 0 : i32
    return %arg0, %c0_i32 : i32, i32
  }
}

</mosaic_0001>

<bundles_post_ra>
// kernel: gate_forward.1
= control target key start
LH: loop header
LB: loop body
LE: loop exit
PB: predicated region body
PF: predicated region fallthrough
CT: control target
= control target key end

     0   :  { %v450_v1 = vmov 0   ;;  %s592_s3 = inlined_call_operand.vmem [shape: bf16[128,256], index: 3, kind: input, shape index: {}]   ;;  %s593_s2 = inlined_call_operand.vmem [shape: bf16[128,256], index: 2, kind: input, shape index: {}]   ;;  %s594_s1 = inlined_call_operand.vmem [shape: bf16[16,128], index: 1, kind: input, shape index: {}]   ;;  %s595_s0 = inlined_call_operand.vmem [shape: bf16[16,128], index: 0, kind: input, shape index: {}]   ;;  %s596_s4 = inlined_call_operand.vmem [shape: f32[1,128], index: 4, kind: input, shape index: {}]   ;;  %s597_s5 = inlined_call_operand.vmem [shape: f32[16,128], index: 5, kind: output, shape index: {}]  }
   0x1   :  { %v388_v0 = vld [vmem:[%s592_s3 + $0x4] ss:$8 sps:$4 sm:$0xff]   ;;  %175 = vmatprep.mubr.bf16.mxu1 %v450_v1  ;;  %304 = vmatprep.mubr.bf16.mxu0 %v450_v1  ;;  %v392_v3 = vld [vmem:[%s592_s3] ss:$8 sps:$4 sm:$0xff]   ;;  %v394_v5 = vld [vmem:[%s592_s3 + $0x14] ss:$8 sps:$4 sm:$0xff]  }
   0x2   :  { %v390_v2 = vld [vmem:[%s593_s2 + $0x4] ss:$8 sps:$4 sm:$0xff]   ;;  %143 = vmatprep.subr.bf16.mxu1 %v388_v0  ;;  %v393_v4 = vld [vmem:[%s593_s2] ss:$8 sps:$4 sm:$0xff]   ;;  %v396_v6 = vld [vmem:[%s593_s2 + $0x14] ss:$8 sps:$4 sm:$0xff]  }
   0x3   :  { %272 = vmatprep.subr.bf16.mxu0 %v390_v2  ;;  %144 = vmatpush1.bf16.msra.mxu1 %v392_v3  ;;  %v398_v7 = vld [vmem:[%s592_s3 + $0x10] ss:$8 sps:$4 sm:$0xff]   ;;  %v400_v9 = vld [vmem:[%s592_s3 + $0x24] ss:$8 sps:$4 sm:$0xff]   ;;  %v404_v11 = vld [vmem:[%s592_s3 + $0x20] ss:$8 sps:$4 sm:$0xff]  }
   0x4   :  { %273 = vmatpush1.bf16.msra.mxu0 %v393_v4  ;;  %145 = vmatprep.subr.bf16.mxu1 %v394_v5  ;;  %v399_v8 = vld [vmem:[%s593_s2 + $0x10] ss:$8 sps:$4 sm:$0xff]   ;;  %v402_v10 = vld [vmem:[%s593_s2 + $0x24] ss:$8 sps:$4 sm:$0xff]   ;;  %v405_v12 = vld [vmem:[%s593_s2 + $0x20] ss:$8 sps:$4 sm:$0xff]  }
   0x5   :  { %274 = vmatprep.subr.bf16.mxu0 %v396_v6  ;;  %v406_v13 = vld [vmem:[%s592_s3 + $0x34] ss:$8 sps:$4 sm:$0xff]   ;;  %v410_v15 = vld [vmem:[%s592_s3 + $0x30] ss:$8 sps:$4 sm:$0xff]   ;;  %v412_v17 = vld [vmem:[%s592_s3 + $0x44] ss:$8 sps:$4 sm:$0xff]  }
   0x6   :  { %v408_v14 = vld [vmem:[%s593_s2 + $0x34] ss:$8 sps:$4 sm:$0xff]   ;;  %v411_v16 = vld [vmem:[%s593_s2 + $0x30] ss:$8 sps:$4 sm:$0xff]   ;;  %v414_v18 = vld [vmem:[%s593_s2 + $0x44] ss:$8 sps:$4 sm:$0xff]  }
   0x7   :  { %146 = vmatpush1.bf16.msra.mxu1 %v398_v7  ;;  %v416_v19 = vld [vmem:[%s592_s3 + $0x40] ss:$8 sps:$4 sm:$0xff]   ;;  %v418_v21 = vld [vmem:[%s592_s3 + $0x54] ss:$8 sps:$4 sm:$0xff]   ;;  %v422_v23 = vld [vmem:[%s592_s3 + $0x50] ss:$8 sps:$4 sm:$0xff]  }
   0x8   :  { %275 = vmatpush1.bf16.msra.mxu0 %v399_v8  ;;  %147 = vmatprep.subr.bf16.mxu1 %v400_v9  ;;  %v417_v20 = vld [vmem:[%s593_s2 + $0x40] ss:$8 sps:$4 sm:$0xff]   ;;  %v420_v22 = vld [vmem:[%s593_s2 + $0x54] ss:$8 sps:$4 sm:$0xff]   ;;  %v423_v24 = vld [vmem:[%s593_s2 + $0x50] ss:$8 sps:$4 sm:$0xff]  }
   0x9   :  { %276 = vmatprep.subr.bf16.mxu0 %v402_v10  ;;  %v424_v25 = vld [vmem:[%s592_s3 + $0x64] ss:$8 sps:$4 sm:$0xff]   ;;  %v428_v27 = vld [vmem:[%s592_s3 + $0x60] ss:$8 sps:$4 sm:$0xff]   ;;  %v430_v29 = vld [vmem:[%s592_s3 + $0x74] ss:$8 sps:$4 sm:$0xff]  }
   0xa   :  { %v426_v26 = vld [vmem:[%s593_s2 + $0x64] ss:$8 sps:$4 sm:$0xff]   ;;  %v429_v28 = vld [vmem:[%s593_s2 + $0x60] ss:$8 sps:$4 sm:$0xff]   ;;  %v432_v30 = vld [vmem:[%s593_s2 + $0x74] ss:$8 sps:$4 sm:$0xff]  }
   0xb   :  { %148 = vmatpush1.bf16.msra.mxu1 %v404_v11  ;;  %v434_v31 = vld [vmem:[%s592_s3 + $0x70] ss:$8 sps:$4 sm:$0xff]   ;;  %v436_v33 = vld [vmem:[%s594_s1] sm:$0xff]  }
   0xc   :  { %277 = vmatpush1.bf16.msra.mxu0 %v405_v12  ;;  %149 = vmatprep.subr.bf16.mxu1 %v406_v13  ;;  %v435_v32 = vld [vmem:[%s593_s2 + $0x70] ss:$8 sps:$4 sm:$0xff]   ;;  %v437_v34 = vld [vmem:[%s595_s0] sm:$0xff]  }
   0xd   :  { %278 = vmatprep.subr.bf16.mxu0 %v408_v14  ;;  %v380_v37 = vld [vmem:[%s596_s4] ss:$0 sm:$0xff] }
   0xf   :  { %150 = vmatpush1.bf16.msra.mxu1 %v410_v15 }
  0x10   :  { %279 = vmatpush1.bf16.msra.mxu0 %v411_v16  ;;  %151 = vmatprep.subr.bf16.mxu1 %v412_v17 }
  0x11   :  { %280 = vmatprep.subr.bf16.mxu0 %v414_v18 }
  0x13   :  { %152 = vmatpush1.bf16.msra.mxu1 %v416_v19 }
  0x14   :  { %281 = vmatpush1.bf16.msra.mxu0 %v417_v20  ;;  %153 = vmatprep.subr.bf16.mxu1 %v418_v21 }
  0x15   :  { %282 = vmatprep.subr.bf16.mxu0 %v420_v22 }
  0x17   :  { %154 = vmatpush1.bf16.msra.mxu1 %v422_v23 }
  0x18   :  { %283 = vmatpush1.bf16.msra.mxu0 %v423_v24  ;;  %155 = vmatprep.subr.bf16.mxu1 %v424_v25 }
  0x19   :  { %284 = vmatprep.subr.bf16.mxu0 %v426_v26 }
  0x1b   :  { %156 = vmatpush1.bf16.msra.mxu1 %v428_v27 }
  0x1c   :  { %285 = vmatpush1.bf16.msra.mxu0 %v429_v28  ;;  %157 = vmatprep.subr.bf16.mxu1 %v430_v29 }
  0x1d   :  { %286 = vmatprep.subr.bf16.mxu0 %v432_v30 }
  0x1f   :  { %158 = vmatpush1.bf16.msra.mxu1 %v434_v31 }
  0x20   :  { %287 = vmatpush1.bf16.msra.mxu0 %v435_v32 }
  0x22   :  { %176 = vmatmul.mubr.bf16.vlgmr.msra.gmra.mrb[0].mxu1 %v436_v33 }
  0x23   :  { %305 = vmatmul.mubr.bf16.vlgmr.msra.gmra.mrb[0].mxu0 %v437_v34 }
  0xf5   :  { %v177_v35 = vpop.f32.mrb[0].mxu1 }
  0xf6   :  { %v306_v36 = vpop.f32.mrb[0].mxu0  ;;  %v179_v39 = vpop.f32.mrb[1].mxu1 }
  0xf7   :  { %v307_v38 = vadd.f32 %v306_v36, %v177_v35  ;;  %v308_v40 = vpop.f32.mrb[1].mxu0  ;;  %v181_v42 = vpop.f32.mrb[2].mxu1 }
  0xf8   :  { %v309_v41 = vadd.f32 %v308_v40, %v179_v39  ;;  %v310_v43 = vpop.f32.mrb[2].mxu0  ;;  %v183_v46 = vpop.f32.mrb[3].mxu1 }
  0xf9   :  { %v322_v44 = vadd.f32 %v380_v37, %v307_v38  ;;  %v311_v45 = vadd.f32 %v310_v43, %v181_v42  ;;  %v312_v47 = vpop.f32.mrb[3].mxu0 }
  0xfa   :  { %v313_v48 = vadd.f32 %v312_v47, %v183_v46 }
  0xfb   :  { %v381_v49 = vmul.f32 -1.442695, %v322_v44  ;;  %v323_v50 = vadd.f32 %v380_v37, %v311_v45 }
  0xfd   :  { %438 = vpow2.f32 %v381_v49  ;;  %v382_v51 = vmul.f32 -1.442695, %v323_v50 }
  0xff   :  { %440 = vpow2.f32 %v382_v51 }
 0x100   :  { %442 = vtanh.f32 %v309_v41 }
 0x107   :  { %v439_v52 = vpop.eup %438 }
 0x108   :  { %v330_v53 = vadd.f32 1.0, %v439_v52 }
 0x109   :  { %v441_v54 = vpop.eup %440 }
 0x10a   :  { %444 = vrcp.f32 %v330_v53  ;;  %v331_v55 = vadd.f32 1.0, %v441_v54  ;;  %v443_v56 = vpop.eup %442 }
 0x10b   :  { %446 = vtanh.f32 %v313_v48 }
 0x10c   :  { %448 = vrcp.f32 %v331_v55 }
 0x114   :  { %v445_v57 = vpop.eup %444 }
 0x115   :  { %v447_v58 = vpop.eup %446  ;;  %v338_v59 = vmul.f32 %v445_v57, %v443_v56 }
 0x116   :  { %v449_v60 = vpop.eup %448 }
 0x117   :  { %340 = vst [vmem:[%s597_s5] sm:$0xff] %v338_v59  ;;  %v339_v61 = vmul.f32 %v449_v60, %v447_v58 }
 0x119   :  { %341 = vst [vmem:[%s597_s5 + $0x8] sm:$0xff] %v339_v61 }

</bundles_post_ra>
